<compile_context>
chip_gen: v7x
topology: tpu7x:2x2x1
jax: 0.10.0
libtpu: 0.0.40
codegen_flags: <defaults>
</compile_context>

<pallas_src>
import jax
import jax.numpy as jnp
from jax import lax
from jax.experimental import pallas as pl
from jax.experimental.pallas import tpu as pltpu

EPS = 1e-5  # nn.LayerNorm default


def layernorm_ncl_kernel(x_ref, o_ref):
    # x_ref / o_ref: (1, C, TL) — full C on sublanes (reduction axis),
    # lane-dense L tile on lanes. Compute in f32, biased variance (LayerNorm).
    x = x_ref[...].astype(jnp.float32)
    mean = jnp.mean(x, axis=1, keepdims=True)
    xc = x - mean
    var = jnp.mean(xc * xc, axis=1, keepdims=True)
    inv = lax.rsqrt(var + EPS)
    o_ref[...] = (xc * inv).astype(o_ref.dtype)


def _pick_lane_tile(C, L, itemsize):
    """Lane (last-dim) tile: full L when small, else a 128-multiple sized so one
    block stays well under ~1 MiB (4 double-buffered copies + f32 temps fit the
    scoped VMEM on v5e/v6e/v7x) while keeping several grid steps for pipelining."""
    if L <= 128:
        return L  # equal to full array dim -> always a legal block shape
    budget = 1 << 20  # ~1 MiB per block buffer
    tl = (budget // max(1, C * itemsize)) // 128 * 128
    tl = max(128, min(tl, 2048))
    return min(tl, (L // 128) * 128)  # partial last block (if any) is masked by Pallas


@jax.jit
def layer_norm_ncl(x):
    """x: (B, C, L). LayerNorm over C per (b, l) position. Same shape/dtype out."""
    B, C, L = x.shape
    tl = _pick_lane_tile(C, L, x.dtype.itemsize)
    nl = pl.cdiv(L, tl)
    # Never tile C (the reduction axis) — full C per block keeps mean/var exact.
    spec = pl.BlockSpec((1, C, tl), lambda b, l: (b, 0, l))
    return pl.pallas_call(
        layernorm_ncl_kernel,
        out_shape=jax.ShapeDtypeStruct((B, C, L), x.dtype),
        grid_spec=pl.GridSpec(
            grid=(B, nl),
            in_specs=[spec],
            out_specs=spec,
        ),
        compiler_params=pltpu.CompilerParams(
            dimension_semantics=("parallel", "parallel"),
            vmem_limit_bytes=32 * 1024 * 1024,  # headroom even on v7x (64 MiB physical)
        ),
    )(x)


def layer_norm_ref(x):
    # Pure-JAX reference matching the PyTorch module semantics.
    xt = jnp.transpose(x, (0, 2, 1)).astype(jnp.float32)
    mean = jnp.mean(xt, axis=-1, keepdims=True)
    var = jnp.mean((xt - mean) ** 2, axis=-1, keepdims=True)
    y = (xt - mean) / jnp.sqrt(var + EPS)
    return jnp.transpose(y, (0, 2, 1)).astype(x.dtype)


if __name__ == "__main__":
    # elementwise_affine=False -> no learnable parameters.
    key = jax.random.PRNGKey(0)
    k1, k2 = jax.random.split(key)

    # Primary small shape consistent with the module (filters = C = 32).
    B, C, L = 2, 32, 16
    x = jax.random.normal(k1, (B, C, L), dtype=jnp.float32)
    out = jax.block_until_ready(layer_norm_ncl(x))
    assert out.shape == (B, C, L)
    assert jnp.allclose(out, layer_norm_ref(x), atol=1e-5, rtol=1e-5), "mismatch vs reference (small)"

    # Secondary shape exercising the lane-tiled, multi-block-L path (TL=2048, 2 L tiles).
    x2 = jax.random.normal(k2, (2, 32, 4096), dtype=jnp.float32)
    out2 = jax.block_until_ready(layer_norm_ncl(x2))
    assert jnp.allclose(out2, layer_norm_ref(x2), atol=1e-5, rtol=1e-5), "mismatch vs reference (tiled)"

    print("KERNEL_OK")
</pallas_src>

<mosaic_0001>
module attributes {stable_mosaic.version = 11 : i64} {
  func.func @layernorm_ncl_kernel(%arg0: i32, %arg1: i32, %arg2: memref<1x32x16xf32, #tpu.memory_space<vmem>>, %arg3: memref<1x32x16xf32, #tpu.memory_space<vmem>>) attributes {dimension_semantics = [#tpu.dimension_semantics<parallel>, #tpu.dimension_semantics<parallel>], iteration_bounds = array<i64: 2, 1>, scalar_prefetch = 0 : i64, scratch_operands = 0 : i64, tpu.core_type = #tpu.core_type<tc>, window_params = [{transform_indices = @transform_0, window_bounds = array<i64: 1, 32, 16>}, {transform_indices = @transform_1, window_bounds = array<i64: 1, 32, 16>}]} {
    %c0 = arith.constant 0 : index
    %c0_0 = arith.constant 0 : index
    %c0_1 = arith.constant 0 : index
    %0 = vector.load %arg2[%c0, %c0_0, %c0_1] : memref<1x32x16xf32, #tpu.memory_space<vmem>>, vector<1x32x16xf32>
    %cst = arith.constant dense<0.000000e+00> : vector<1x16xf32>
    %1 = vector.multi_reduction <add>, %0, %cst [1] : vector<1x32x16xf32> to vector<1x16xf32>
    %2 = vector.shape_cast %1 : vector<1x16xf32> to vector<1x1x16xf32>
    %cst_2 = arith.constant 3.200000e+01 : f32
    %3 = vector.broadcast %cst_2 : f32 to vector<1x1x16xf32>
    %4 = arith.divf %2, %3 : vector<1x1x16xf32>
    %5 = vector.broadcast %4 : vector<1x1x16xf32> to vector<1x32x16xf32>
    %6 = arith.subf %0, %5 : vector<1x32x16xf32>
    %7 = arith.mulf %6, %6 : vector<1x32x16xf32>
    %cst_3 = arith.constant dense<0.000000e+00> : vector<1x16xf32>
    %8 = vector.multi_reduction <add>, %7, %cst_3 [1] : vector<1x32x16xf32> to vector<1x16xf32>
    %9 = vector.shape_cast %8 : vector<1x16xf32> to vector<1x1x16xf32>
    %cst_4 = arith.constant 3.200000e+01 : f32
    %10 = vector.broadcast %cst_4 : f32 to vector<1x1x16xf32>
    %11 = arith.divf %9, %10 : vector<1x1x16xf32>
    %cst_5 = arith.constant 9.99999974E-6 : f32
    %12 = vector.broadcast %cst_5 : f32 to vector<1x1x16xf32>
    %13 = arith.addf %11, %12 : vector<1x1x16xf32>
    %14 = math.rsqrt %13 : vector<1x1x16xf32>
    %15 = vector.broadcast %14 : vector<1x1x16xf32> to vector<1x32x16xf32>
    %16 = arith.mulf %6, %15 : vector<1x32x16xf32>
    %c0_6 = arith.constant 0 : index
    %c0_7 = arith.constant 0 : index
    %c0_8 = arith.constant 0 : index
    %17 = vector.load %arg3[%c0_6, %c0_7, %c0_8] : memref<1x32x16xf32, #tpu.memory_space<vmem>>, vector<1x32x16xf32>
    tpu.vector_store %arg3[%c0_6, %c0_7, %c0_8], %16 {strides = array<i32>} : memref<1x32x16xf32, #tpu.memory_space<vmem>>, vector<1x32x16xf32>,
    return
  }
  func.func @transform_0(%arg0: i32, %arg1: i32) -> (i32, i32, i32) {
    %c0_i32 = arith.constant 0 : i32
    %c0_i32_0 = arith.constant 0 : i32
    return %arg0, %c0_i32, %arg1 : i32, i32, i32
  }
  func.func @transform_1(%arg0: i32, %arg1: i32) -> (i32, i32, i32) {
    %c0_i32 = arith.constant 0 : i32
    %c0_i32_0 = arith.constant 0 : i32
    return %arg0, %c0_i32, %arg1 : i32, i32, i32
  }
}

</mosaic_0001>

<bundles_post_ra>
// kernel: layer_norm_ncl.1
= control target key start
LH: loop header
LB: loop body
LE: loop exit
PB: predicated region body
PF: predicated region fallthrough
CT: control target
= control target key end

     0   :  { %s356_s6 = smov 0   ;;  %s358_s7 = smov 0   ;;  %s408_s0 = inlined_call_operand.vmem [shape: f32[2,32,16], index: 0, kind: input, shape index: {}]   ;;  %s409_s1 = inlined_call_operand.vmem [shape: f32[2,32,16], index: 1, kind: output, shape index: {}]  }
   0x1   :  { %s360_s8 = smov 0  }
   0x2 LB: > { %s23_s9 = sadd.s32 1, %s340_s7  ;;  %p287_p0 = scmp.ge.s32.totalorder %s344_s8, 1  ;;  %s344_s8 = sphi %s360_s8, %s11_s8   ;;  %s340_s7 = sphi %s358_s7, %s411_s7   ;;  %s336_s6 = sphi %s356_s6, %s410_s6  }
   0x3   : > { %p25_p1 = scmp.ge.s32.totalorder %s23_s9, 2  ;;  %p106_p2 = scmp.lt.s32.totalorder %s344_s8, 3 }
   0x5   : > { %s413_s9 = smov (%p25_p1, %s23_s9), 0  ;;  %p107_p3 = pnand %p287_p0, %p106_p2 }
   0x6   : > { %p132_p4 = scmp.lt.s32.totalorder (!%p107_p3), %s336_s6, 1  ;;  %vm152_vm0 = vcmask (!%p107_p3), 130048  }
   0x7   : > { %110 = sbr.rel (%p107_p3) target bundleno = 81 (0x51), region = 24 }
   0xe   : > { %s415_s6 = smov (!%p132_p4, %s336_s6), 1 }
   0xf   : > { %s294_s10 = sshll.u32 %s415_s6, 5 }
  0x10   : > { %s139_s13 = scalar_lea.vmem %s408_s0, %s294_s10  ;;  %s147_s16 = scalar_lea.vmem %s409_s1, %s294_s10 }
  0x11   : > { %v148_v0 = vld [vmem:[%s139_s13] sm:$0xff]  ;;  %v149_v1 = vld [vmem:[%s139_s13 + $0x8] sm:$0xff]  ;;  %v150_v2 = vld [vmem:[%s139_s13 + $0x10] sm:$0xff] }
  0x12   : > { %v151_v3 = vld [vmem:[%s139_s13 + $0x18] sm:$0xff]  ;;  %v153_v4 = vsel %vm152_vm0, %v148_v0, 0.0  ;;  %v154_v5 = vsel %vm152_vm0, %v149_v1, 0.0  ;;  %v156_v6 = vsel %vm152_vm0, %v150_v2, 0.0 }
  0x13   : > { %v155_v7 = vadd.f32 %v154_v5, %v153_v4  ;;  %v158_v8 = vsel %vm152_vm0, %v151_v3, 0.0 }
  0x15   : > { %v157_v9 = vadd.f32 %v156_v6, %v155_v7 }
  0x17   : > { %v159_v10 = vadd.f32 %v158_v8, %v157_v9 }
  0x19   : > { %v160_v11 = vrot.slane %v159_v10, 4 }
  0x1b   : > { %v161_v12 = vadd.f32 %v160_v11, %v159_v10 }
  0x1d   : > { %v162_v13 = vrot.slane %v161_v12, 2 }
  0x1f   : > { %v163_v14 = vadd.f32 %v162_v13, %v161_v12 }
  0x21   : > { %v164_v15 = vrot.slane %v163_v14, 1 }
  0x23   : > { %v165_v16 = vadd.f32 %v164_v15, %v163_v14 }
  0x25   : > { %v167_v17 = vmul.f32 0.03125, %v165_v16 }
  0x27   : > { %v168_v18 = vsub.f32 %v148_v0, %v167_v17  ;;  %v169_v19 = vsub.f32 %v149_v1, %v167_v17  ;;  %v170_v20 = vsub.f32 %v150_v2, %v167_v17  ;;  %v171_v21 = vsub.f32 %v151_v3, %v167_v17 }
  0x29   : > { %v172_v22 = vmul.f32 %v168_v18, %v168_v18  ;;  %v173_v23 = vmul.f32 %v169_v19, %v169_v19  ;;  %v174_v24 = vmul.f32 %v170_v20, %v170_v20  ;;  %v175_v25 = vmul.f32 %v171_v21, %v171_v21 }
  0x2b   : > { %v176_v26 = vsel %vm152_vm0, %v172_v22, 0.0  ;;  %v177_v27 = vsel %vm152_vm0, %v173_v23, 0.0  ;;  %v179_v28 = vsel %vm152_vm0, %v174_v24, 0.0  ;;  %v181_v30 = vsel %vm152_vm0, %v175_v25, 0.0 }
  0x2c   : > { %v178_v29 = vadd.f32 %v177_v27, %v176_v26 }
  0x2e   : > { %v180_v31 = vadd.f32 %v179_v28, %v178_v29 }
  0x30   : > { %v182_v32 = vadd.f32 %v181_v30, %v180_v31 }
  0x32   : > { %v183_v33 = vrot.slane %v182_v32, 4 }
  0x34   : > { %v184_v34 = vadd.f32 %v183_v33, %v182_v32 }
  0x36   : > { %v185_v35 = vrot.slane %v184_v34, 2 }
  0x38   : > { %v186_v36 = vadd.f32 %v185_v35, %v184_v34 }
  0x3a   : > { %v187_v37 = vrot.slane %v186_v36, 1 }
  0x3c   : > { %v188_v38 = vadd.f32 %v187_v37, %v186_v36 }
  0x3e   : > { %v189_v39 = vmul.f32 0.03125, %v188_v38 }
  0x40   : > { %v190_v40 = vadd.f32 1e-05, %v189_v39 }
  0x42   : > { %320 = vrsqrt.f32 %v190_v40 }
  0x4c   : > { %v321_v41 = vpop.eup %320 }
  0x4d   : > { %v192_v42 = vmul.f32 %v321_v41, %v168_v18  ;;  %v193_v43 = vmul.f32 %v321_v41, %v169_v19  ;;  %v194_v44 = vmul.f32 %v321_v41, %v170_v20  ;;  %v195_v45 = vmul.f32 %v321_v41, %v171_v21 }
  0x4f   : > { %196 = vst.msk [vmem:[%s147_s16] sm:$0xff] %vm152_vm0, %v192_v42  ;;  %197 = vst.msk [vmem:[%s147_s16 + $0x8] sm:$0xff] %vm152_vm0, %v193_v43 }
  0x50   : > { %198 = vst.msk [vmem:[%s147_s16 + $0x10] sm:$0xff] %vm152_vm0, %v194_v44  ;;  %199 = vst.msk [vmem:[%s147_s16 + $0x18] sm:$0xff] %vm152_vm0, %v195_v45 }
  0x51 PF: > { %s11_s8 = sadd.s32 1, %s344_s8   ;;  %s410_s6 = smov %s340_s7 }
  0x52   : > { %p8_p5 = scmp.ge.s32.totalorder %s11_s8, 4   ;;  %s411_s7 = smov %s413_s9 }
  0x54   :  { %10 = sbr.rel (!%p8_p5) target bundleno = 2 (0x2), region = 54 }

</bundles_post_ra>
